<compile_context>
chip_gen: v7x
topology: tpu7x:2x2x1
jax: 0.10.0
libtpu: 0.0.40
codegen_flags: <defaults>
</compile_context>

<pallas_src>
import jax
import jax.numpy as jnp
from jax.experimental import pallas as pl
from jax.experimental.pallas import tpu as pltpu


# ----------------------------------------------------------------------------
# helpers
# ----------------------------------------------------------------------------
def _round_up(x: int, m: int) -> int:
    return (x + m - 1) // m * m


def _vmem_capacity_bytes() -> int:
    """Best-effort VMEM capacity query; conservative (64 MiB) fallback."""
    try:
        return int(pltpu.get_tpu_info().vmem_capacity_bytes)
    except Exception:
        return 64 * 1024 * 1024


def _sublane_multiple(dtype) -> int:
    # Native sublane packing: f32 -> 8, bf16/f16 -> 16, int8/fp8 -> 32.
    return {4: 8, 2: 16, 1: 32}.get(jnp.dtype(dtype).itemsize, 8)


# ----------------------------------------------------------------------------
# kernels
# ----------------------------------------------------------------------------
def _swiglu_kernel_single(x_ref, wg_ref, wu_ref, wd_ref, o_ref):
    # Whole I in one slice: no accumulator, write the result directly.
    x = x_ref[...]
    g = jnp.dot(x, wg_ref[...], preferred_element_type=jnp.float32)
    u = jnp.dot(x, wu_ref[...], preferred_element_type=jnp.float32)
    h = (g * jax.nn.sigmoid(g)) * u          # SiLU(g) * u; sigmoid -> EUP slot
    # h is cast back to the activation dtype before the down projection; this
    # matches common bf16 LLM practice and is a no-op for f32 inputs.
    o_ref[...] = jnp.dot(h.astype(x.dtype), wd_ref[...],
                         preferred_element_type=jnp.float32).astype(o_ref.dtype)


def _swiglu_kernel_acc(x_ref, wg_ref, wu_ref, wd_ref, o_ref, acc_ref):
    # grid = (token_tiles, I_tiles); I axis is last (reduction / "arbitrary").
    # x_ref:  (tm, H)    token tile (resident across the I axis)
    # wg_ref: (H, ti)    gate_proj slice
    # wu_ref: (H, ti)    up_proj slice
    # wd_ref: (ti, H)    down_proj slice
    # o_ref:  (tm, H)    output tile (written once, at the last I step)
    # acc_ref:(tm, H)    f32 accumulator scratch
    ki = pl.program_id(1)

    @pl.when(ki == 0)
    def _():
        acc_ref[...] = jnp.zeros_like(acc_ref)

    x = x_ref[...]
    g = jnp.dot(x, wg_ref[...], preferred_element_type=jnp.float32)
    u = jnp.dot(x, wu_ref[...], preferred_element_type=jnp.float32)
    h = (g * jax.nn.sigmoid(g)) * u
    acc_ref[...] += jnp.dot(h.astype(x.dtype), wd_ref[...],
                            preferred_element_type=jnp.float32)

    @pl.when(ki == pl.num_programs(1) - 1)
    def _():
        o_ref[...] = acc_ref[...].astype(o_ref.dtype)


# ----------------------------------------------------------------------------
# wrapper
# ----------------------------------------------------------------------------
def swiglu_pallas(x, wg, wu, wd, *, tm=None, ti=None):
    """x: [T, H]; wg/wu: [H, I]; wd: [I, H] -> [T, H].

    tm / ti override the token-tile / intermediate-slice sizes (tests); by
    default they are chosen from the hardware's VMEM capacity.
    """
    T, H = x.shape
    I = wg.shape[1]
    assert wg.shape == (H, I) and wu.shape == (H, I) and wd.shape == (I, H)

    x_bytes = jnp.dtype(x.dtype).itemsize
    w_bytes = jnp.dtype(wg.dtype).itemsize

    vmem_cap = _vmem_capacity_bytes()
    budget = int(vmem_cap * 0.75)                 # headroom for Mosaic scratch
    small_vmem = vmem_cap <= 64 * 1024 * 1024     # v7x-class: 64 MiB/TC, 2 TCs

    sub = _sublane_multiple(x.dtype)

    def footprint(tm_, ti_, multi):
        fp = 2 * 3 * H * ti_ * w_bytes            # double-buffered weight slices
        fp += 2 * 2 * tm_ * H * x_bytes           # x + out tiles (double-buffered)
        fp += 3 * tm_ * ti_ * 4                   # f32 g / u / h temporaries
        if multi:
            fp += tm_ * H * 4                     # f32 accumulator scratch
        return fp

    # ---- token tile --------------------------------------------------------
    tm_target = _round_up(tm, sub) if tm is not None else 512
    tm_eff = min(tm_target, _round_up(T, sub))
    # Megacore heuristic for 2-TensorCore parts: if everything would land in a
    # single token tile, split it so both cores get work.
    if tm is None and small_vmem and T <= tm_eff and T >= 256:
        half = _round_up(-(-T // 2), 128)
        if half < tm_eff:
            tm_eff = half
    t_pad = _round_up(T, tm_eff)

    # ---- intermediate (I) slice --------------------------------------------
    ti_target_default = 256 if small_vmem else 1024
    ti_eff = None
    i_pad = I
    multi_i = False

    if ti is None:
        if footprint(tm_eff, I, False) <= budget:
            ti_eff = I                            # single-slice fast path
    elif ti >= I:
        ti_eff = I

    if ti_eff is None:
        # Streamed I: pick a lane-aligned slice that fits VMEM; shrink tm if
        # even a 128-wide slice does not fit.
        while True:
            head = tm_eff * H * (4 * x_bytes + 4)
            denom = 6 * H * w_bytes + 12 * tm_eff
            ti_max = (budget - head) // denom if budget > head else 0
            want = ti if ti is not None else ti_target_default
            ti_cap = (min(want, ti_max) // 128) * 128
            if ti_cap >= 128 or tm_eff <= max(128, sub):
                break
            tm_eff = max(_round_up(max(tm_eff // 2, sub), sub), sub)
        ti_cap = max(ti_cap, 128)
        t_pad = _round_up(T, tm_eff)              # tm_eff may have shrunk

        # Prefer a divisor of I -> no weight padding (no extra HBM copies).
        ti_eff = 0
        d = ti_cap
        while d >= 128:
            if I % d == 0:
                ti_eff = d
                break
            d -= 128
        if ti_eff:
            i_pad = I
        else:
            # Ragged I with no lane-aligned divisor: zero-pad (exact for
            # SwiGLU).  # TODO(synk): handle the ragged last I-slice in-kernel.
            ti_eff = ti_cap
            i_pad = _round_up(I, ti_eff)
        multi_i = i_pad > ti_eff

    # ---- padding (tokens always exact; weights only in the ragged fallback) -
    if t_pad != T:
        x = jnp.pad(x, ((0, t_pad - T), (0, 0)))
    if i_pad != I:
        wg = jnp.pad(wg, ((0, 0), (0, i_pad - I)))
        wu = jnp.pad(wu, ((0, 0), (0, i_pad - I)))
        wd = jnp.pad(wd, ((0, i_pad - I), (0, 0)))

    # ---- grid / specs -------------------------------------------------------
    if multi_i:
        grid = (t_pad // tm_eff, i_pad // ti_eff)
        kernel = _swiglu_kernel_acc
        in_specs = [
            pl.BlockSpec((tm_eff, H), lambda i, k: (i, 0)),     # x tile
            pl.BlockSpec((H, ti_eff), lambda i, k: (0, k)),     # gate slice
            pl.BlockSpec((H, ti_eff), lambda i, k: (0, k)),     # up slice
            pl.BlockSpec((ti_eff, H), lambda i, k: (k, 0)),     # down slice
        ]
        out_specs = pl.BlockSpec((tm_eff, H), lambda i, k: (i, 0))
        scratch_shapes = [pltpu.VMEM((tm_eff, H), jnp.float32)]
        dim_sem = ("parallel", "arbitrary")
    else:
        grid = (t_pad // tm_eff,)
        kernel = _swiglu_kernel_single
        in_specs = [
            pl.BlockSpec((tm_eff, H), lambda i: (i, 0)),
            pl.BlockSpec((H, ti_eff), lambda i: (0, 0)),
            pl.BlockSpec((H, ti_eff), lambda i: (0, 0)),
            pl.BlockSpec((ti_eff, H), lambda i: (0, 0)),
        ]
        out_specs = pl.BlockSpec((tm_eff, H), lambda i: (i, 0))
        scratch_shapes = []
        dim_sem = ("parallel",)

    fp = footprint(tm_eff, ti_eff, multi_i)
    vmem_limit_bytes = int(min(vmem_cap * 0.85,
                               max(32 * 1024 * 1024, fp * 3 // 2)))

    # Honest HBM-traffic estimate: weights are re-streamed once per token
    # tile; x is read once and the output written once.
    t_tiles = t_pad // tm_eff
    cost = pl.CostEstimate(
        flops=6 * t_pad * H * i_pad,
        transcendentals=t_pad * i_pad,
        bytes_accessed=int(t_tiles * 3 * H * i_pad * w_bytes
                           + 2 * t_pad * H * x_bytes),
    )

    out = pl.pallas_call(
        kernel,
        out_shape=jax.ShapeDtypeStruct((t_pad, H), x.dtype),
        grid_spec=pltpu.PrefetchScalarGridSpec(
            num_scalar_prefetch=0,
            grid=grid,
            in_specs=in_specs,
            out_specs=out_specs,
            scratch_shapes=scratch_shapes,
        ),
        compiler_params=pltpu.CompilerParams(
            dimension_semantics=dim_sem,
            vmem_limit_bytes=vmem_limit_bytes,
        ),
        cost_estimate=cost,
    )(x, wg, wu, wd)

    return out[:T] if t_pad != T else out


def swiglu_reference(x, wg, wu, wd):
    g = x @ wg
    u = x @ wu
    return (g * jax.nn.sigmoid(g) * u) @ wd


if __name__ == "__main__":
    batch, seq, hidden, inter = 2, 8, 32, 64

    key = jax.random.PRNGKey(0)
    kx, kg, ku, kd = jax.random.split(key, 4)

    # Deterministic parameter init (kaiming-uniform-ish scale like nn.Linear).
    def init(k, fan_in, shape):
        bound = 1.0 / (fan_in ** 0.5)
        return jax.random.uniform(k, shape, jnp.float32, -bound, bound)

    # Stored as [in, out] (transpose of PyTorch's [out, in]).
    wg = init(kg, hidden, (hidden, inter))   # gate_proj
    wu = init(ku, hidden, (hidden, inter))   # up_proj
    wd = init(kd, inter, (inter, hidden))    # down_proj

    x = jax.random.normal(kx, (batch, seq, hidden), jnp.float32)
    x2d = x.reshape(batch * seq, hidden)

    out2d = swiglu_pallas(x2d, wg, wu, wd)            # single-I-slice fast path
    out = out2d.reshape(batch, seq, hidden)
    jax.block_until_ready(out)

    ref = swiglu_reference(x2d, wg, wu, wd).reshape(batch, seq, hidden)
    assert out.shape == (batch, seq, hidden)
    assert jnp.allclose(out, ref, atol=1e-5, rtol=1e-5), "mismatch vs reference"

    # Exercise the streamed-I accumulator path and ragged-T padding
    # (T not a tile multiple, I split into multiple lane-aligned slices).
    T2, H2, I2 = 200, 128, 512
    k1, k2, k3, k4 = jax.random.split(jax.random.PRNGKey(1), 4)
    x2 = jax.random.normal(k1, (T2, H2), jnp.float32)
    wg2 = init(k2, H2, (H2, I2))
    wu2 = init(k3, H2, (H2, I2))
    wd2 = init(k4, I2, (I2, H2))
    out2 = swiglu_pallas(x2, wg2, wu2, wd2, tm=128, ti=128)
    jax.block_until_ready(out2)
    ref2 = swiglu_reference(x2, wg2, wu2, wd2)
    assert jnp.allclose(out2, ref2, atol=1e-4, rtol=1e-4), "mismatch (tiled path)"

    print("KERNEL_OK")
</pallas_src>

<mosaic_0001>
module attributes {stable_mosaic.version = 11 : i64} {
  func.func @_swiglu_kernel_single(%arg0: i32, %arg1: memref<16x32xf32, #tpu.memory_space<vmem>>, %arg2: memref<32x64xf32, #tpu.memory_space<vmem>>, %arg3: memref<32x64xf32, #tpu.memory_space<vmem>>, %arg4: memref<64x32xf32, #tpu.memory_space<vmem>>, %arg5: memref<16x32xf32, #tpu.memory_space<vmem>>) attributes {dimension_semantics = [#tpu.dimension_semantics<parallel>], iteration_bounds = array<i64: 1>, scalar_prefetch = 0 : i64, scratch_operands = 0 : i64, tpu.core_type = #tpu.core_type<tc>, window_params = [{transform_indices = @transform_0, window_bounds = array<i64: 16, 32>}, {pipeline_mode = #tpu.pipeline_mode<synchronous>, transform_indices = @transform_1, window_bounds = array<i64: 32, 64>}, {pipeline_mode = #tpu.pipeline_mode<synchronous>, transform_indices = @transform_2, window_bounds = array<i64: 32, 64>}, {pipeline_mode = #tpu.pipeline_mode<synchronous>, transform_indices = @transform_3, window_bounds = array<i64: 64, 32>}, {transform_indices = @transform_4, window_bounds = array<i64: 16, 32>}]} {
    %c0 = arith.constant 0 : index
    %c0_0 = arith.constant 0 : index
    %0 = vector.load %arg1[%c0, %c0_0] : memref<16x32xf32, #tpu.memory_space<vmem>>, vector<16x32xf32>
    %c0_1 = arith.constant 0 : index
    %c0_2 = arith.constant 0 : index
    %1 = vector.load %arg2[%c0_1, %c0_2] : memref<32x64xf32, #tpu.memory_space<vmem>>, vector<32x64xf32>
    %cst = arith.constant dense<0.000000e+00> : vector<16x64xf32>
    %2 = tpu.matmul %0, %1, %cst {dimension_numbers = #tpu.dot_dimension_numbers<[1], [0], [0], [1], [0, 0, 1, 1], [], []>} : vector<16x32xf32>, vector<32x64xf32>, vector<16x64xf32> -> vector<16x64xf32>
    %c0_3 = arith.constant 0 : index
    %c0_4 = arith.constant 0 : index
    %3 = vector.load %arg3[%c0_3, %c0_4] : memref<32x64xf32, #tpu.memory_space<vmem>>, vector<32x64xf32>
    %cst_5 = arith.constant dense<0.000000e+00> : vector<16x64xf32>
    %4 = tpu.matmul %0, %3, %cst_5 {dimension_numbers = #tpu.dot_dimension_numbers<[1], [0], [0], [1], [0, 0, 1, 1], [], []>} : vector<16x32xf32>, vector<32x64xf32>, vector<16x64xf32> -> vector<16x64xf32>
    %5 = arith.negf %2 : vector<16x64xf32>
    %6 = math.exp %5 : vector<16x64xf32>
    %cst_6 = arith.constant 1.000000e+00 : f32
    %7 = vector.broadcast %cst_6 : f32 to vector<16x64xf32>
    %8 = arith.addf %7, %6 : vector<16x64xf32>
    %9 = arith.divf %7, %8 : vector<16x64xf32>
    %10 = arith.mulf %2, %9 : vector<16x64xf32>
    %11 = arith.mulf %10, %4 : vector<16x64xf32>
    %c0_7 = arith.constant 0 : index
    %c0_8 = arith.constant 0 : index
    %12 = vector.load %arg4[%c0_7, %c0_8] : memref<64x32xf32, #tpu.memory_space<vmem>>, vector<64x32xf32>
    %cst_9 = arith.constant dense<0.000000e+00> : vector<16x32xf32>
    %13 = tpu.matmul %11, %12, %cst_9 {dimension_numbers = #tpu.dot_dimension_numbers<[1], [0], [0], [1], [0, 0, 1, 1], [], []>} : vector<16x64xf32>, vector<64x32xf32>, vector<16x32xf32> -> vector<16x32xf32>
    %c0_10 = arith.constant 0 : index
    %c0_11 = arith.constant 0 : index
    %14 = vector.load %arg5[%c0_10, %c0_11] : memref<16x32xf32, #tpu.memory_space<vmem>>, vector<16x32xf32>
    tpu.vector_store %arg5[%c0_10, %c0_11], %13 {strides = array<i32>} : memref<16x32xf32, #tpu.memory_space<vmem>>, vector<16x32xf32>,
    return
  }
  func.func @transform_0(%arg0: i32) -> (i32, i32) {
    %c0_i32 = arith.constant 0 : i32
    %c0_i32_0 = arith.constant 0 : i32
    return %arg0, %c0_i32 : i32, i32
  }
  func.func @transform_1(%arg0: i32) -> (i32, i32) {
    %c0_i32 = arith.constant 0 : i32
    %c0_i32_0 = arith.constant 0 : i32
    %c0_i32_1 = arith.constant 0 : i32
    return %c0_i32, %c0_i32_0 : i32, i32
  }
  func.func @transform_2(%arg0: i32) -> (i32, i32) {
    %c0_i32 = arith.constant 0 : i32
    %c0_i32_0 = arith.constant 0 : i32
    %c0_i32_1 = arith.constant 0 : i32
    return %c0_i32, %c0_i32_0 : i32, i32
  }
  func.func @transform_3(%arg0: i32) -> (i32, i32) {
    %c0_i32 = arith.constant 0 : i32
    %c0_i32_0 = arith.constant 0 : i32
    %c0_i32_1 = arith.constant 0 : i32
    return %c0_i32, %c0_i32_0 : i32, i32
  }
  func.func @transform_4(%arg0: i32) -> (i32, i32) {
    %c0_i32 = arith.constant 0 : i32
    %c0_i32_0 = arith.constant 0 : i32
    return %arg0, %c0_i32 : i32, i32
  }
}

</mosaic_0001>

<bundles_post_ra>
// kernel: tpu_custom_call.1
= control target key start
LH: loop header
LB: loop body
LE: loop exit
PB: predicated region body
PF: predicated region fallthrough
CT: control target
= control target key end

     0   :  { %vm24_vm0 = vcmask 261120   ;;  %s547_s0 = inlined_call_operand.vmem [shape: f32[16,32], index: 0, kind: input, shape index: {}]   ;;  %s548_s1 = inlined_call_operand.vmem [shape: f32[32,64], index: 1, kind: input, shape index: {}]   ;;  %s549_s2 = inlined_call_operand.vmem [shape: f32[32,64], index: 2, kind: input, shape index: {}]   ;;  %s550_s3 = inlined_call_operand.vmem [shape: f32[64,32], index: 3, kind: input, shape index: {}]   ;;  %s551_s4 = inlined_call_operand.hbm [shape: f32[16,32], index: 4, kind: output, shape index: {}]  }
   0x1   :  { %v20_v0 = vld [vmem:[%s548_s1] sm:$0xff]  ;;  %v21_v1 = vld [vmem:[%s548_s1 + $0x8] sm:$0xff]  ;;  %v22_v2 = vld [vmem:[%s548_s1 + $0x10] sm:$0xff] }
   0x2   :  { %v380_v3 = vpack.c.bf16 %v21_v1, %v20_v0  ;;  %v23_v4 = vld [vmem:[%s548_s1 + $0x18] sm:$0xff]  ;;  %v18_v5 = vld [vmem:[%s547_s0] sm:$0xff]  ;;  %v107_v8 = vld [vmem:[%s549_s2 + $0x8] sm:$0xff] }
   0x3   :  { %v384_v6 = vpack.c.bf16 %v23_v4, %v22_v2  ;;  %347 = vmatprep.mubr.msk.f32.mxu1 %vm24_vm0, %v18_v5  ;;  %v106_v7 = vld [vmem:[%s549_s2] sm:$0xff] }
   0x4   :  { %381 = vmatprep.subr.bf16.mxu1 %v380_v3 }
   0x5   :  { %9 = vsyncpa [#allocation3], 0  ;;  %383 = vmatpush3.bf16.msra.mxu1 %v380_v3  ;;  %v388_v9 = vpack.c.bf16 %v107_v8, %v106_v7  ;;  %v108_v10 = vld [vmem:[%s549_s2 + $0x10] sm:$0xff]  ;;  %v109_v11 = vld [vmem:[%s549_s2 + $0x18] sm:$0xff]  ;;  %vm209_vm1 = vcmask 523264  }
   0x6   :  { %385 = vmatprep.subr.bf16.mxu1 %v384_v6  ;;  %v19_v12 = vld [vmem:[%s547_s0 + $0x8] sm:$0xff]  ;;  %v392_v13 = vpack.c.bf16 %v109_v11, %v108_v10  ;;  %v201_v14 = vld [vmem:[%s550_s3] sm:$0xff]  ;;  %v203_v17 = vld [vmem:[%s550_s3 + $0x10] sm:$0xff] }
   0x7   :  { %v202_v15 = vld [vmem:[%s550_s3 + $0x8] sm:$0xff]  ;;  %v204_v18 = vld [vmem:[%s550_s3 + $0x18] sm:$0xff]  ;;  %v205_v20 = vld [vmem:[%s550_s3 + $0x20] sm:$0xff] }
   0x8   :  { %v396_v16 = vpack.c.bf16 %v202_v15, %v201_v14  ;;  %v400_v19 = vpack.c.bf16 %v204_v18, %v203_v17  ;;  %v206_v21 = vld [vmem:[%s550_s3 + $0x28] sm:$0xff]  ;;  %v207_v23 = vld [vmem:[%s550_s3 + $0x30] sm:$0xff]  ;;  %v208_v24 = vld [vmem:[%s550_s3 + $0x38] sm:$0xff]  ;;  %s447_s3 = smov [#allocation2]  }
   0x9   :  { %387 = vmatpush3.bf16.msra.mxu1 %v384_v6  ;;  %v404_v22 = vpack.c.bf16 %v206_v21, %v205_v20  ;;  %v408_v25 = vpack.c.bf16 %v208_v24, %v207_v23  ;;  %s298_s22 = sshll.u32 %s447_s3, 4  ;;  %s299_s22 = int_to_ptr.vmem [resolvable:$true] %s298_s22 }
   0xa   :  { %389 = vmatprep.subr.bf16.mxu1 %v388_v9  ;;  %397 = vmatprep.subr.bf16.mxu0 %v396_v16  ;;  %s423_s23 = scalar_lea.vmem %s299_s22, 256  ;;  %p428_p1 = scmp.lt.s32.totalorder %s299_s22, %s299_s22 }
   0xb   :  { %399 = vmatpush3.bf16.msra.mxu0 %v396_v16  ;;  %p424_p0 = scmp.ne.s32.totalorder %s299_s22, %s423_s23  ;;  %p429_p2 = scmp.lt.s32.totalorder %s423_s23, %s423_s23 }
   0xc   :  { %348 = vmatmul.mubr.msk.f32.vlgmr.msra.gmra.mrb[0].mxu1 %vm24_vm0, %v19_v12  ;;  %401 = vmatprep.subr.bf16.mxu0 %v400_v19 }
   0xd   :  { %391 = vmatpush3.bf16.msra.mxu1 %v388_v9  ;;  %358 = vmatprep.mubr.msk.f32.mxu1 %vm24_vm0, %v18_v5  ;;  %p430_p3 = por %p429_p2, %p428_p1 }
   0xe   :  { %393 = vmatprep.subr.bf16.mxu1 %v392_v13 }
   0xf   :  { %403 = vmatpush3.bf16.msra.mxu0 %v400_v19  ;;  %p431_p4 = pnand %p430_p3, %p424_p0 }
  0x10   :  { %405 = vmatprep.subr.bf16.mxu0 %v404_v22 }
  0x11   :  { %395 = vmatpush3.bf16.msra.mxu1 %v392_v13 }
  0x13   :  { %407 = vmatpush3.bf16.msra.mxu0 %v404_v22 }
  0x14   :  { %359 = vmatmul.mubr.msk.f32.vlgmr.msra.gmra.mrb[2].mxu1 %vm24_vm0, %v19_v12  ;;  %409 = vmatprep.subr.bf16.mxu0 %v408_v25 }
  0x17   :  { %411 = vmatpush3.bf16.msra.mxu0 %v408_v25 }
  0xdf   :  { %v349_v26 = vpop.f32.mrb[0].mxu1 }
  0xe0   :  { %v314_v27 = vmul.f32 -1.442695, %v349_v26  ;;  %v97_v28 = vpop.f32.mrb[1].mxu1 }
  0xe1   :  { %v313_v29 = vmul.f32 -1.442695, %v97_v28 }
  0xe2   :  { %415 = vpow2.f32 %v314_v27 }
  0xe3   :  { %417 = vpow2.f32 %v313_v29 }
  0xe7   :  { %v360_v30 = vpop.f32.mrb[2].mxu1 }
  0xe8   :  { %v176_v31 = vpop.f32.mrb[3].mxu1 }
  0xec   :  { %v416_v32 = vpop.eup %415 }
  0xed   :  { %v418_v33 = vpop.eup %417  ;;  %v192_v34 = vadd.f32 1.0, %v416_v32 }
  0xee   :  { %v191_v35 = vadd.f32 1.0, %v418_v33 }
  0xef   :  { %419 = vrcp.f32 %v192_v34 }
  0xf0   :  { %421 = vrcp.f32 %v191_v35 }
  0xf9   :  { %v420_v36 = vpop.eup %419 }
  0xfa   :  { %v422_v37 = vpop.eup %421  ;;  %v198_v38 = vmul.f32 %v420_v36, %v349_v26 }
  0xfb   :  { %v197_v39 = vmul.f32 %v422_v37, %v97_v28 }
  0xfc   :  { %v200_v40 = vmul.f32 %v360_v30, %v198_v38 }
  0xfd   :  { %v199_v41 = vmul.f32 %v197_v39, %v176_v31 }
  0xff   :  { %377 = vmatprep.mubr.msk.f32.mxu0 %vm209_vm1, %v199_v41 }
 0x100   :  { %378 = vmatmul.mubr.msk.f32.vlgmr.msra.gmra.mrb[0].mxu0 %vm209_vm1, %v200_v40 }
 0x1d3   :  { %v379_v42 = vpop.f32.mrb[0].mxu0 }
 0x1d4   :  { %292 = vst.msk [vmem:[#allocation2 + $0x8] sm:$0xff] %vm24_vm0, %v379_v42  ;;  %v282_v43 = vpop.f32.mrb[1].mxu0 }
 0x1d5   :  { %291 = vst.msk [vmem:[#allocation2] sm:$0xff] %vm24_vm0, %v282_v43 }
 0x1d6   :  { %434 = shalt.err (!%p431_p4)
}
 0x1d7   :  { %s435_s26 = scalar_lea.hbm %s551_s4, 256 }
 0x1d8   :  { %p436_p5 = scmp.ne.s32.totalorder %s551_s4, %s435_s26  ;;  %p439_p6 = scmp.lt.u32.totalorder %s435_s26, %s551_s4 }
 0x1da   :  { %p441_p7 = pnand %p439_p6, %p436_p5 }
 0x1dc   :  { %444 = shalt.err (!%p441_p7)
}
 0x1dd   :  { %s448_s30 = smov 128   ;;  %s449_s5 = smov 8  }
 0x1de   :  { %304 = dma.vmem_to_hbm [thread:$0]  %s299_s22, 256, %s551_s4, [#allocation3], %s448_s30, %s448_s30, %s449_s5  }
 0x1df   :  { %445 = dma.done.wait [#allocation3], 256  }
 0x1e0   :  { %446 = vsyncadd [#allocation3], 4294967040 }
 0x1e1   :  { %308 = vsyncpa [#allocation3], 1 }

</bundles_post_ra>
